<compile_context>
chip_gen: v6e
topology: v6e:2x2x1
jax: 0.10.0
libtpu: 0.0.40
codegen_flags: <defaults>
</compile_context>

<pallas_src>
import functools
import math

import jax
import jax.numpy as jnp
from jax import lax
from jax.experimental import pallas as pl
from jax.experimental.pallas import tpu as pltpu


# ----------------------------------------------------------------------------
# Kernel 1 (producer): h = x @ W ; s1 = h @ a1 ; s2 = a2 . h^T   (row tiled)
# ----------------------------------------------------------------------------
def _producer_kernel(x_ref, w_ref, a1_ref, a2_ref, h_ref, s1_ref, s2_ref):
    h = jnp.dot(x_ref[...], w_ref[...], preferred_element_type=jnp.float32)
    # bf16 neighbor-feature stream for the attention kernel's MXU operand.
    h_ref[...] = h.astype(h_ref.dtype)
    # Query-side score term (j-invariant): (tile, 1), stays f32.
    s1_ref[...] = jnp.dot(h, a1_ref[...], preferred_element_type=jnp.float32)
    # Neighbor-side score term (i-invariant), laid out as a row (1, tile) so the
    # attention kernel can slice it lane-wise without any transpose.
    s2_ref[...] = lax.dot_general(
        a2_ref[...], h, dimension_numbers=(((1,), (1,)), ((), ())),
        preferred_element_type=jnp.float32)


def _producer(x, w, a1, a2, *, tile_n):
    n, f_in = x.shape
    f_out = w.shape[1]
    return pl.pallas_call(
        _producer_kernel,
        out_shape=(
            jax.ShapeDtypeStruct((n, f_out), jnp.bfloat16),   # h (bf16)
            jax.ShapeDtypeStruct((n, 1), jnp.float32),        # s1
            jax.ShapeDtypeStruct((1, n), jnp.float32),        # s2 (row layout)
        ),
        grid_spec=pltpu.PrefetchScalarGridSpec(
            num_scalar_prefetch=0,
            grid=(n // tile_n,),
            in_specs=[
                pl.BlockSpec((tile_n, f_in), lambda i: (i, 0)),
                pl.BlockSpec((f_in, f_out), lambda i: (0, 0)),
                pl.BlockSpec((f_out, 1), lambda i: (0, 0)),
                pl.BlockSpec((1, f_out), lambda i: (0, 0)),
            ],
            out_specs=[
                pl.BlockSpec((tile_n, f_out), lambda i: (i, 0)),
                pl.BlockSpec((tile_n, 1), lambda i: (i, 0)),
                pl.BlockSpec((1, tile_n), lambda i: (0, i)),
            ],
        ),
        compiler_params=pltpu.CompilerParams(
            dimension_semantics=("parallel",)),
    )(x, w, a1, a2)


# ----------------------------------------------------------------------------
# Kernel 2: masked GAT attention, online accumulation over neighbor tiles
# ----------------------------------------------------------------------------
def _spgat_attn_kernel(nnz_ref, adj_ref, haug_ref, s1_ref, s2_ref,
                       out_ref, acc_ref, *, alpha, concat, f_out):
    i = pl.program_id(0)
    j = pl.program_id(1)

    @pl.when(j == 0)
    def _init():
        acc_ref[...] = jnp.zeros_like(acc_ref)

    # Skip blocks with no edges at all (block-sparse structural skip).
    @pl.when(nnz_ref[i, j] > 0)
    def _compute():
        # score[p, q] = s1[p] + s2[q]  -- pure VPU broadcast add.
        score = s1_ref[...] + s2_ref[...]                    # (ti,1)+(1,tj) -> (ti,tj)
        leaky = jnp.where(score > 0, score, alpha * score)   # LeakyReLU(alpha)
        e = jnp.exp(-leaky)
        e = jnp.where(adj_ref[...] != 0, e, 0.0)             # edges only (int8 mask)
        # One MXU matmul gives numerator (cols :F) and rowsum (last col, the
        # ones column of h_aug). bf16 operands, f32 accumulation.
        acc_ref[...] += jnp.dot(e.astype(jnp.bfloat16), haug_ref[...],
                                preferred_element_type=jnp.float32)

    @pl.when(j == pl.num_programs(1) - 1)
    def _finalize():
        acc = acc_ref[...]
        num = acc[:, :f_out]                                  # (ti, F)
        inv = pl.reciprocal(acc[:, f_out:], approx=True)      # (ti, 1) on the EUP
        h_prime = num * inv
        if concat:
            # ELU (alpha=1), same as F.elu
            h_prime = jnp.where(h_prime > 0, h_prime, jnp.exp(h_prime) - 1.0)
        out_ref[...] = h_prime.astype(out_ref.dtype)


def sp_graph_attention_layer(x, adj, w, a, *, alpha, concat=True,
                             tile_i=256, tile_j=512):
    """SpGraphAttentionLayer.forward (eval mode) for a dense adjacency mask."""
    n, f_in = x.shape
    f_out = w.shape[1]
    assert adj.shape == (n, n), adj.shape
    assert a.shape == (1, 2 * f_out), a.shape

    tile_i = min(tile_i, n)
    tile_j = min(tile_j, n)
    assert n % tile_i == 0 and n % tile_j == 0, (n, tile_i, tile_j)
    assert tile_i % 32 == 0 and tile_j % 128 == 0, (tile_i, tile_j)

    # Only the nonzero pattern matters: stream adjacency as int8 (4x less HBM).
    adj_i8 = (adj != 0).astype(jnp.int8)

    # Per-(i,j)-block edge counts -> scalar-prefetched skip table (SMEM).
    n_i, n_j = n // tile_i, n // tile_j
    block_nnz = jnp.sum(
        adj_i8.reshape(n_i, tile_i, n_j, tile_j).astype(jnp.int32), axis=(1, 3))

    # Tiny one-time layout prep of the attention vector.
    a1 = a[:, :f_out].T                      # (F, 1): query-side coefficients
    a2 = a[:, f_out:]                        # (1, F): neighbor-side coefficients

    # Fused producer: projection + both score matvecs in one row-parallel pass.
    h_bf16, s1, s2 = _producer(x, w, a1, a2, tile_n=tile_i)

    # Neighbor stream with a ones column so e @ h_aug also yields the rowsum.
    h_aug = jnp.concatenate(
        [h_bf16, jnp.ones((n, 1), dtype=jnp.bfloat16)], axis=1)   # (N, F+1)

    kernel = functools.partial(_spgat_attn_kernel, alpha=alpha, concat=concat,
                               f_out=f_out)
    return pl.pallas_call(
        kernel,
        out_shape=jax.ShapeDtypeStruct((n, f_out), jnp.float32),
        grid_spec=pltpu.PrefetchScalarGridSpec(
            num_scalar_prefetch=1,                      # block_nnz -> SMEM
            grid=(n_i, n_j),
            in_specs=[
                pl.BlockSpec((tile_i, tile_j), lambda i, j, nnz: (i, j)),   # adj
                pl.BlockSpec((tile_j, f_out + 1), lambda i, j, nnz: (j, 0)),# h_aug
                pl.BlockSpec((tile_i, 1), lambda i, j, nnz: (i, 0)),        # s1
                pl.BlockSpec((1, tile_j), lambda i, j, nnz: (0, j)),        # s2
            ],
            out_specs=pl.BlockSpec((tile_i, f_out), lambda i, j, nnz: (i, 0)),
            scratch_shapes=[
                pltpu.VMEM((tile_i, f_out + 1), jnp.float32),  # [num | rowsum] acc
            ],
        ),
        compiler_params=pltpu.CompilerParams(
            dimension_semantics=("parallel", "arbitrary"),
            # Actual use is ~4 MiB (int8 adj double-buffer + f32 temporaries);
            # 48 MiB stays inside v7x's 64 MiB physical VMEM.
            vmem_limit_bytes=48 * 1024 * 1024,
        ),
    )(block_nnz, adj_i8, h_aug, s1, s2)


# ----------------------------------------------------------------------------
# Pure-JAX reference and test harness
# ----------------------------------------------------------------------------
def sp_graph_attention_layer_ref(x, adj, w, a, *, alpha, concat=True):
    f_out = w.shape[1]
    hp = jax.lax.Precision.HIGHEST
    h = jnp.dot(x, w, precision=hp)
    s1 = jnp.dot(h, a[0, :f_out], precision=hp)          # (N,)
    s2 = jnp.dot(h, a[0, f_out:], precision=hp)          # (N,)
    score = s1[:, None] + s2[None, :]
    leaky = jnp.where(score > 0, score, alpha * score)
    e = jnp.where(adj != 0, jnp.exp(-leaky), 0.0)
    rowsum = jnp.sum(e, axis=1, keepdims=True)
    h_prime = jnp.dot(e, h, precision=hp) / rowsum
    if concat:
        h_prime = jnp.where(h_prime > 0, h_prime, jnp.exp(h_prime) - 1.0)
    return h_prime


def xavier_normal(key, shape, gain=1.414):
    std = gain * math.sqrt(2.0 / (shape[0] + shape[1]))
    return std * jax.random.normal(key, shape, dtype=jnp.float32)


if __name__ == "__main__":
    # Small synthetic graph: 1024 nodes, 16 -> 32 features, alpha=0.2, concat.
    # (grid = 4 i-tiles x 2 j-tiles with the default 256x512 tiling)
    N = 1024
    in_features, out_features = 16, 32
    alpha = 0.2
    dropout = 0.5   # unused: eval-mode forward (dropout == identity)
    concat = True

    root = jax.random.PRNGKey(0)
    k_x, k_adj, k_w, k_a = jax.random.split(root, 4)

    x = jax.random.normal(k_x, (N, in_features), dtype=jnp.float32)

    # Sparse-ish 0/1 adjacency with self-loops (every node has >= 1 edge, so no
    # divide-by-zero -- the PyTorch module would NaN there too).
    adj = (jax.random.uniform(k_adj, (N, N)) < 0.05).astype(jnp.float32)
    adj = jnp.maximum(adj, jnp.eye(N, dtype=jnp.float32))

    W = xavier_normal(k_w, (in_features, out_features))
    a = xavier_normal(k_a, (1, 2 * out_features))

    out = sp_graph_attention_layer(x, adj, W, a, alpha=alpha, concat=concat)
    out = jax.block_until_ready(out)

    ref = sp_graph_attention_layer_ref(x, adj, W, a, alpha=alpha, concat=concat)
    assert out.shape == (N, out_features), out.shape
    err = float(jnp.max(jnp.abs(out - ref)))
    # bf16 MXU operands + approx reciprocal => slightly looser tolerance than
    # a pure-f32 kernel (expected max abs err ~1e-2 vs the f32 reference).
    assert err < 3e-2, f"mismatch: max abs err {err}"

    print("KERNEL_OK")
</pallas_src>

<mosaic_0001>
module attributes {stable_mosaic.version = 11 : i64} {
  func.func @_producer_kernel(%arg0: i32, %arg1: memref<256x16xf32, #tpu.memory_space<vmem>>, %arg2: memref<16x32xf32, #tpu.memory_space<vmem>>, %arg3: memref<32x1xf32, #tpu.memory_space<vmem>>, %arg4: memref<1x32xf32, #tpu.memory_space<vmem>>, %arg5: memref<256x32xbf16, #tpu.memory_space<vmem>>, %arg6: memref<256x1xf32, #tpu.memory_space<vmem>>, %arg7: memref<1x256xf32, #tpu.memory_space<vmem>>) attributes {dimension_semantics = [#tpu.dimension_semantics<parallel>], iteration_bounds = array<i64: 4>, scalar_prefetch = 0 : i64, scratch_operands = 0 : i64, tpu.core_type = #tpu.core_type<tc>, window_params = [{transform_indices = @transform_0, window_bounds = array<i64: 256, 16>}, {pipeline_mode = #tpu.pipeline_mode<synchronous>, transform_indices = @transform_1, window_bounds = array<i64: 16, 32>}, {pipeline_mode = #tpu.pipeline_mode<synchronous>, transform_indices = @transform_2, window_bounds = array<i64: 32, 1>}, {pipeline_mode = #tpu.pipeline_mode<synchronous>, transform_indices = @transform_3, window_bounds = array<i64: 1, 32>}, {transform_indices = @transform_4, window_bounds = array<i64: 256, 32>}, {transform_indices = @transform_5, window_bounds = array<i64: 256, 1>}, {transform_indices = @transform_6, window_bounds = array<i64: 1, 256>}]} {
    %c0 = arith.constant 0 : index
    %c0_0 = arith.constant 0 : index
    %0 = vector.load %arg1[%c0, %c0_0] : memref<256x16xf32, #tpu.memory_space<vmem>>, vector<256x16xf32>
    %c0_1 = arith.constant 0 : index
    %c0_2 = arith.constant 0 : index
    %1 = vector.load %arg2[%c0_1, %c0_2] : memref<16x32xf32, #tpu.memory_space<vmem>>, vector<16x32xf32>
    %cst = arith.constant dense<0.000000e+00> : vector<256x32xf32>
    %2 = tpu.matmul %0, %1, %cst {dimension_numbers = #tpu.dot_dimension_numbers<[1], [0], [0], [1], [0, 0, 1, 1], [], []>} : vector<256x16xf32>, vector<16x32xf32>, vector<256x32xf32> -> vector<256x32xf32>
    %3 = arith.truncf %2 : vector<256x32xf32> to vector<256x32xbf16>
    %c0_3 = arith.constant 0 : index
    %c0_4 = arith.constant 0 : index
    %4 = vector.load %arg5[%c0_3, %c0_4] : memref<256x32xbf16, #tpu.memory_space<vmem>>, vector<256x32xbf16>
    tpu.vector_store %arg5[%c0_3, %c0_4], %3 {strides = array<i32>} : memref<256x32xbf16, #tpu.memory_space<vmem>>, vector<256x32xbf16>,
    %c0_5 = arith.constant 0 : index
    %c0_6 = arith.constant 0 : index
    %5 = vector.load %arg3[%c0_5, %c0_6] : memref<32x1xf32, #tpu.memory_space<vmem>>, vector<32x1xf32>
    %cst_7 = arith.constant dense<0.000000e+00> : vector<256x1xf32>
    %6 = tpu.matmul %2, %5, %cst_7 {dimension_numbers = #tpu.dot_dimension_numbers<[1], [0], [0], [1], [0, 0, 1, 1], [], []>} : vector<256x32xf32>, vector<32x1xf32>, vector<256x1xf32> -> vector<256x1xf32>
    %c0_8 = arith.constant 0 : index
    %c0_9 = arith.constant 0 : index
    %7 = vector.load %arg6[%c0_8, %c0_9] : memref<256x1xf32, #tpu.memory_space<vmem>>, vector<256x1xf32>
    tpu.vector_store %arg6[%c0_8, %c0_9], %6 {strides = array<i32>} : memref<256x1xf32, #tpu.memory_space<vmem>>, vector<256x1xf32>,
    %c0_10 = arith.constant 0 : index
    %c0_11 = arith.constant 0 : index
    %8 = vector.load %arg4[%c0_10, %c0_11] : memref<1x32xf32, #tpu.memory_space<vmem>>, vector<1x32xf32>
    %cst_12 = arith.constant dense<0.000000e+00> : vector<1x256xf32>
    %9 = tpu.matmul %8, %2, %cst_12 {dimension_numbers = #tpu.dot_dimension_numbers<[1], [1], [0], [0], [0, 0, 1, 0], [], []>} : vector<1x32xf32>, vector<256x32xf32>, vector<1x256xf32> -> vector<1x256xf32>
    %c0_13 = arith.constant 0 : index
    %c0_14 = arith.constant 0 : index
    %10 = vector.load %arg7[%c0_13, %c0_14] : memref<1x256xf32, #tpu.memory_space<vmem>>, vector<1x256xf32>
    tpu.vector_store %arg7[%c0_13, %c0_14], %9 {strides = array<i32>} : memref<1x256xf32, #tpu.memory_space<vmem>>, vector<1x256xf32>,
    return
  }
  func.func @transform_0(%arg0: i32) -> (i32, i32) {
    %c0_i32 = arith.constant 0 : i32
    %c0_i32_0 = arith.constant 0 : i32
    return %arg0, %c0_i32 : i32, i32
  }
  func.func @transform_1(%arg0: i32) -> (i32, i32) {
    %c0_i32 = arith.constant 0 : i32
    %c0_i32_0 = arith.constant 0 : i32
    %c0_i32_1 = arith.constant 0 : i32
    return %c0_i32, %c0_i32_0 : i32, i32
  }
  func.func @transform_2(%arg0: i32) -> (i32, i32) {
    %c0_i32 = arith.constant 0 : i32
    %c0_i32_0 = arith.constant 0 : i32
    %c0_i32_1 = arith.constant 0 : i32
    return %c0_i32, %c0_i32_0 : i32, i32
  }
  func.func @transform_3(%arg0: i32) -> (i32, i32) {
    %c0_i32 = arith.constant 0 : i32
    %c0_i32_0 = arith.constant 0 : i32
    %c0_i32_1 = arith.constant 0 : i32
    return %c0_i32, %c0_i32_0 : i32, i32
  }
  func.func @transform_4(%arg0: i32) -> (i32, i32) {
    %c0_i32 = arith.constant 0 : i32
    %c0_i32_0 = arith.constant 0 : i32
    return %arg0, %c0_i32 : i32, i32
  }
  func.func @transform_5(%arg0: i32) -> (i32, i32) {
    %c0_i32 = arith.constant 0 : i32
    %c0_i32_0 = arith.constant 0 : i32
    return %arg0, %c0_i32 : i32, i32
  }
  func.func @transform_6(%arg0: i32) -> (i32, i32) {
    %c0_i32 = arith.constant 0 : i32
    %c0_i32_0 = arith.constant 0 : i32
    return %c0_i32, %arg0 : i32, i32
  }
}

</mosaic_0001>

<bundles_post_ra>
// kernel: tpu_custom_call.1
= control target key start
LH: loop header
LB: loop body
LE: loop exit
PB: predicated region body
PF: predicated region fallthrough
CT: control target
= control target key end

     0   :  { %12 = vsyncpa [#allocation3], 0  ;;  %s2446_s0 = inlined_call_operand.vmem [shape: f32[1024,16], index: 0, kind: input, shape index: {}]   ;;  %s2447_s1 = inlined_call_operand.vmem [shape: f32[16,32], index: 1, kind: input, shape index: {}]   ;;  %s2448_s2 = inlined_call_operand.vmem [shape: f32[32,1], index: 2, kind: input, shape index: {}]   ;;  %s2449_s3 = inlined_call_operand.vmem [shape: f32[1,32], index: 3, kind: input, shape index: {}]   ;;  %s2450_s4 = inlined_call_operand.vmem [shape: bf16[1024,32], index: 4, kind: output, shape index: {0}]   ;;  %s2451_s5 = inlined_call_operand.vmem [shape: f32[1024,1], index: 5, kind: output, shape index: {1}]   ;;  %s2452_s6 = inlined_call_operand.hbm [shape: f32[1,1024], index: 6, kind: output, shape index: {2}]  }
   0x1   :  { %14 = vsyncpa [#allocation3 + $0x1], 0  ;;  %s1925_s21 = smov 0   ;;  %s1927_s22 = smov 0  }
   0x2   :  { %s1929_s23 = smov 0   ;;  %s1931_s24 = smov 0  }
   0x3 LB: > { %s1395_s25 = sadd.s32 4294967295, %s1886_s24   ;;  %s1396_s26 = sadd.s32 4294967294, %s1886_s24   ;;  %s1886_s24 = sphi %s1931_s24, %s2458_s24   ;;  %s1882_s23 = sphi %s1929_s23, %s2457_s23   ;;  %s1878_s22 = sphi %s1927_s22, %s2456_s22   ;;  %s1874_s21 = sphi %s1925_s21, %s2455_s21  }
   0x4   : > { %s1948_s27 = sadd.s32 1, %s1886_s24   ;;  %s168_s28 = sadd.s32 1, %s1882_s23 }
   0x5   : > { %s165_s29 = ssub.s32 %s1886_s24, %s1948_s27  ;;  %p178_p0 = scmp.ne.s32.totalorder %s1882_s23, %s1878_s22 }
   0x6   : > { %p166_p1 = scmp.eq.s32.totalorder %s165_s29, 0  ;;  %p179_p2 = scmp.eq.s32.totalorder %s1395_s25, 3 }
   0x7   : > { %p184_p3 = scmp.ne.s32.totalorder %s1878_s22, %s1874_s21  ;;  %p185_p4 = scmp.eq.s32.totalorder %s1396_s26, 3 }
   0x8   : > { %s1958_s30 = scalar_select %p166_p1, %s1882_s23, %s168_s28  }
   0x9   : > { %p1960_p5 = por %p179_p2, %p178_p0  ;;  %p1964_p6 = por %p185_p4, %p184_p3 }
   0xa   : > { %p1399_p7 = scmp.ge.s32.totalorder %s1886_s24, 1  ;;  %p221_p8 = scmp.lt.s32.totalorder %s1886_s24, 5 }
   0xc   : > { %p222_p9 = pnand %p1399_p7, %p221_p8 }
   0xd   : > { %s1976_s13 = sshll.u32 (!%p222_p9), %s1395_s25, 5  ;;  %s1889_s15 = smov (!%p222_p9), [#allocation2]  }
   0xe   : > { %225 = sbr.rel (%p222_p9) target bundleno = 556 (0x22c), region = 36  ;;  %p262_p10 = scmp.lt.s32.totalorder (!%p222_p9), %s1976_s13, 127 }
   0xf   : > { %s1285_s11 = scalar_lea.hbm (!%p222_p9), %s2452_s6, %s1976_s13  ;;  %s1830_s16 = sshll.u32 (!%p222_p9), %s1889_s15, 4  ;;  %s1831_s16 = int_to_ptr.vmem [resolvable:$false] %s1830_s16 }
  0x13   : > { %v313_v0 = vld [vmem:[%s2447_s1 + $0x8] sm:$0xff]  ;;  %v312_v1 = vld [vmem:[%s2447_s1] sm:$0xff]  ;;  %v800_v2 = vld [vmem:[%s2448_s2 + $0x18] sm:$0xff]  ;;  %s1986_s18 = scalar_select %p262_p10, %s1976_s13, 127  ;;  %vm314_vm0 = vcmask 130048   ;;  %vm801_vm1 = vcmask 261120  }
  0x14   : > { %1678 = vmatprep.subr.mxu0 %v313_v0  ;;  %1730 = vmatprep.subr.mxu1 %v800_v2  ;;  %v799_v3 = vld [vmem:[%s2448_s2 + $0x10] sm:$0xff]  ;;  %v798_v36 = vld [vmem:[%s2448_s2 + $0x8] sm:$0xff]  ;;  %v797_v37 = vld [vmem:[%s2448_s2] sm:$0xff]  ;;  %vm764_vm2 = vcmask 257024   ;;  %vm1123_vm3 = vcmask 7168  }
  0x15   : > { %1679 = vmatpush3.msra.mxu0 %v313_v0  ;;  %1731 = vmatpush3.msra.mxu1 %v800_v2  ;;  %s1402_s19 = sshll.u32 %s1986_s18, 3  ;;  %v2069_v38 = vld [vmem:[%s2449_s3] sm:$0x1]  ;;  %s1404_s14 = sshll.u32 %s1986_s18, 2 }
  0x16   : > { %1680 = vmatprep.subr.mxu0 %v312_v1  ;;  %1732 = vmatprep.subr.mxu1 %v799_v3  ;;  %s1994_s26 = scalar_lea.vmem %s2446_s0, %s1402_s19  ;;  %s2077_s17 = scalar_lea.vmem %s2450_s4, %s1404_s14 }
  0x17   : > { %1681 = vmatpush3.msra.mxu0 %v312_v1  ;;  %1733 = vmatpush3.msra.mxu1 %v799_v3  ;;  %v280_v4 = vld [vmem:[%s1994_s26] sm:$0xff]  ;;  %v281_v5 = vld [vmem:[%s1994_s26 + $0x8] sm:$0xff]  ;;  %v282_v6 = vld [vmem:[%s1994_s26 + $0x10] sm:$0xff]  ;;  %s258_s18 = sand.u32 1, %s1878_s22  }
  0x18   : > { %1682 = vmatprep.mubr.msk.f32.mxu0 %vm314_vm0, %v280_v4  ;;  %v283_v7 = vld [vmem:[%s1994_s26 + $0x18] sm:$0xff]  ;;  %v284_v8 = vld [vmem:[%s1994_s26 + $0x20] sm:$0xff]  ;;  %v285_v9 = vld [vmem:[%s1994_s26 + $0x28] sm:$0xff]  ;;  %1734 = vmatprep.subr.mxu1 %v798_v36  ;;  %s1265_s12 = scalar_lea.sflag [#allocation3], %s258_s18 }
  0x19   : > { %1683 = vmatmul.mubr.msk.f32.vlgmr.msra.gmra.mxu0 %vm314_vm0, %v281_v5  ;;  %v286_v10 = vld [vmem:[%s1994_s26 + $0x30] sm:$0xff]  ;;  %v287_v11 = vld [vmem:[%s1994_s26 + $0x38] sm:$0xff]  ;;  %v288_v12 = vld [vmem:[%s1994_s26 + $0x40] sm:$0xff]  ;;  %1735 = vmatpush3.msra.mxu1 %v798_v36 }
  0x1a   : > { %1685 = vmatprep.mubr.msk.f32.mxu0 %vm314_vm0, %v282_v6  ;;  %v289_v13 = vld [vmem:[%s1994_s26 + $0x48] sm:$0xff]  ;;  %v290_v14 = vld [vmem:[%s1994_s26 + $0x50] sm:$0xff]  ;;  %v291_v15 = vld [vmem:[%s1994_s26 + $0x58] sm:$0xff]  ;;  %1736 = vmatprep.subr.mxu1 %v797_v37 }
  0x1b   : > { %v292_v16 = vld [vmem:[%s1994_s26 + $0x60] sm:$0xff]  ;;  %v293_v17 = vld [vmem:[%s1994_s26 + $0x68] sm:$0xff]  ;;  %v294_v18 = vld [vmem:[%s1994_s26 + $0x70] sm:$0xff]  ;;  %1737 = vmatpush3.msra.mxu1 %v797_v37 }
  0x1c   : > { %v295_v19 = vld [vmem:[%s1994_s26 + $0x78] sm:$0xff]  ;;  %v296_v20 = vld [vmem:[%s1994_s26 + $0x80] sm:$0xff]  ;;  %v297_v21 = vld [vmem:[%s1994_s26 + $0x88] sm:$0xff] }
  0x1d   : > { %1686 = vmatmul.mubr.msk.f32.gmra.mxu0 %vm314_vm0, %v283_v7  ;;  %v298_v22 = vld [vmem:[%s1994_s26 + $0x90] sm:$0xff]  ;;  %v299_v23 = vld [vmem:[%s1994_s26 + $0x98] sm:$0xff]  ;;  %v300_v24 = vld [vmem:[%s1994_s26 + $0xa0] sm:$0xff] }
  0x1e   : > { %1688 = vmatprep.mubr.msk.f32.mxu0 %vm314_vm0, %v284_v8  ;;  %v301_v25 = vld [vmem:[%s1994_s26 + $0xa8] sm:$0xff]  ;;  %v302_v26 = vld [vmem:[%s1994_s26 + $0xb0] sm:$0xff]  ;;  %v303_v27 = vld [vmem:[%s1994_s26 + $0xb8] sm:$0xff] }
  0x1f   : > { %v304_v28 = vld [vmem:[%s1994_s26 + $0xc0] sm:$0xff]  ;;  %v305_v29 = vld [vmem:[%s1994_s26 + $0xc8] sm:$0xff]  ;;  %v306_v30 = vld [vmem:[%s1994_s26 + $0xd0] sm:$0xff] }
  0x20   : > { %v307_v31 = vld [vmem:[%s1994_s26 + $0xd8] sm:$0xff]  ;;  %v308_v32 = vld [vmem:[%s1994_s26 + $0xe0] sm:$0xff]  ;;  %v309_v33 = vld [vmem:[%s1994_s26 + $0xe8] sm:$0xff] }
  0x21   : > { %1689 = vmatmul.mubr.msk.f32.gmra.mxu0 %vm314_vm0, %v285_v9  ;;  %v310_v34 = vld [vmem:[%s1994_s26 + $0xf0] sm:$0xff]  ;;  %v311_v35 = vld [vmem:[%s1994_s26 + $0xf8] sm:$0xff]  ;;  %s2346_s26 = scalar_lea.vmem %s2451_s5, %s1402_s19  ;;  %s1400_s19 = sshll.u32 %s258_s18, 1 }
  0x22   : > { %1691 = vmatprep.mubr.msk.f32.mxu0 %vm314_vm0, %v286_v10  ;;  %s260_s28 = scalar_lea.vmem [#allocation2], %s1400_s19 }
  0x23   : > { %s1287_s29 = sshll.u32 %s260_s28, 4  ;;  %s1288_s29 = int_to_ptr.vmem [resolvable:$true] %s1287_s29 }
  0x24   : > { %s1826_s14 = scalar_lea.vmem %s1288_s29, 32  ;;  %p1833_p0 = scmp.lt.s32.totalorder %s1288_s29, %s1831_s16 }
  0x25   : > { %1692 = vmatmul.mubr.msk.f32.gmra.mxu0 %vm314_vm0, %v287_v11  ;;  %p1827_p11 = scmp.ne.s32.totalorder %s1288_s29, %s1826_s14 }
  0x26   : > { %1694 = vmatprep.mubr.msk.f32.mxu0 %vm314_vm0, %v288_v12 }
  0x27   : > { %p1828_p12 = pnand %p1827_p11, %p1960_p5 }
  0x29   : > { %1695 = vmatmul.mubr.msk.f32.gmra.mxu0 %vm314_vm0, %v289_v13  ;;  %p1829_p13 = pneg %p1828_p12 }
  0x2a   : > { %1697 = vmatprep.mubr.msk.f32.mxu0 %vm314_vm0, %v290_v14 }
  0x2d   : > { %1698 = vmatmul.mubr.msk.f32.gmra.mxu0 %vm314_vm0, %v291_v15 }
  0x2e   : > { %1700 = vmatprep.mubr.msk.f32.mxu0 %vm314_vm0, %v292_v16 }
  0x31   : > { %1701 = vmatmul.mubr.msk.f32.gmra.mxu0 %vm314_vm0, %v293_v17 }
  0x32   : > { %1703 = vmatprep.mubr.msk.f32.mxu0 %vm314_vm0, %v294_v18 }
  0x35   : > { %1704 = vmatmul.mubr.msk.f32.gmra.mxu0 %vm314_vm0, %v295_v19 }
  0x36   : > { %1706 = vmatprep.mubr.msk.f32.mxu0 %vm314_vm0, %v296_v20 }
  0x39   : > { %1707 = vmatmul.mubr.msk.f32.gmra.mxu0 %vm314_vm0, %v297_v21 }
  0x3a   : > { %1709 = vmatprep.mubr.msk.f32.mxu0 %vm314_vm0, %v298_v22 }
  0x3d   : > { %1710 = vmatmul.mubr.msk.f32.gmra.mxu0 %vm314_vm0, %v299_v23 }
  0x3e   : > { %1712 = vmatprep.mubr.msk.f32.mxu0 %vm314_vm0, %v300_v24 }
  0x41   : > { %1713 = vmatmul.mubr.msk.f32.gmra.mxu0 %vm314_vm0, %v301_v25 }
  0x42   : > { %1715 = vmatprep.mubr.msk.f32.mxu0 %vm314_vm0, %v302_v26 }
  0x45   : > { %1716 = vmatmul.mubr.msk.f32.gmra.mxu0 %vm314_vm0, %v303_v27 }
  0x46   : > { %1718 = vmatprep.mubr.msk.f32.mxu0 %vm314_vm0, %v304_v28 }
  0x49   : > { %1719 = vmatmul.mubr.msk.f32.gmra.mxu0 %vm314_vm0, %v305_v29 }
  0x4a   : > { %1721 = vmatprep.mubr.msk.f32.mxu0 %vm314_vm0, %v306_v30 }
  0x4d   : > { %1722 = vmatmul.mubr.msk.f32.gmra.mxu0 %vm314_vm0, %v307_v31 }
  0x4e   : > { %1724 = vmatprep.mubr.msk.f32.mxu0 %vm314_vm0, %v308_v32 }
  0x51   : > { %1725 = vmatmul.mubr.msk.f32.gmra.mxu0 %vm314_vm0, %v309_v33 }
  0x52   : > { %1727 = vmatprep.mubr.msk.f32.mxu0 %vm314_vm0, %v310_v34 }
  0x55   : > { %1728 = vmatmul.mubr.msk.f32.gmra.mxu0 %vm314_vm0, %v311_v35 }
  0x56   : > { %1676 = vmatprep.mubr.msk.f32.mxu0 %vm801_vm1, %v2069_v38 }
  0xd9   : > { %v2079_v39 = vpop.f32.mrf.mxu0 }
  0xda   : > { %v1542_v40 = vpack.c.bf16 %v2079_v39, %v2079_v39 }
  0xdb   : > { %v2083_v41 = vpop.f32.mrf.mxu0 }
  0xdc   : > { %766 = vst.msk [vmem:[%s2077_s17 + $0x4] sm:$0xf] %vm764_vm2, %v1542_v40  ;;  %v1541_v42 = vpack.c.bf16 %v2083_v41, %v2083_v41  ;;  %1738 = vmatprep.mubr.msk.f32.mxu1 %vm801_vm1, %v2083_v41 }
  0xdd   : > { %v2091_v43 = vpop.f32.mrf.mxu0  ;;  %1739 = vmatmul.mubr.msk.f32.vlgmr.msra.gmra.mxu1 %vm801_vm1, %v2079_v39 }
  0xde   : > { %765 = vst.msk [vmem:[%s2077_s17] sm:$0xf] %vm764_vm2, %v1541_v42  ;;  %v1544_v44 = vpack.c.bf16 %v2091_v43, %v2091_v43 }
  0xdf   : > { %v2099_v45 = vpop.f32.mrf.mxu0 }
  0xe0   : > { %768 = vst.msk [vmem:[%s2077_s17 + $0xc] sm:$0xf] %vm764_vm2, %v1544_v44  ;;  %v1543_v46 = vpack.c.bf16 %v2099_v45, %v2099_v45  ;;  %1741 = vmatprep.mubr.msk.f32.mxu1 %vm801_vm1, %v2099_v45 }
  0xe1   : > { %v2107_v47 = vpop.f32.mrf.mxu0  ;;  %1742 = vmatmul.mubr.msk.f32.gmra.mxu1 %vm801_vm1, %v2091_v43 }
  0xe2   : > { %767 = vst.msk [vmem:[%s2077_s17 + $0x8] sm:$0xf] %vm764_vm2, %v1543_v46  ;;  %v1546_v48 = vpack.c.bf16 %v2107_v47, %v2107_v47 }
  0xe3   : > { %v2115_v49 = vpop.f32.mrf.mxu0 }
  0xe4   : > { %770 = vst.msk [vmem:[%s2077_s17 + $0x14] sm:$0xf] %vm764_vm2, %v1546_v48  ;;  %v1545_v50 = vpack.c.bf16 %v2115_v49, %v2115_v49  ;;  %1744 = vmatprep.mubr.msk.f32.mxu1 %vm801_vm1, %v2115_v49 }
  0xe5   : > { %v2123_v51 = vpop.f32.mrf.mxu0  ;;  %1745 = vmatmul.mubr.msk.f32.gmra.mxu1 %vm801_vm1, %v2107_v47 }
  0xe6   : > { %769 = vst.msk [vmem:[%s2077_s17 + $0x10] sm:$0xf] %vm764_vm2, %v1545_v50  ;;  %v1548_v52 = vpack.c.bf16 %v2123_v51, %v2123_v51 }
  0xe7   : > { %v2131_v53 = vpop.f32.mrf.mxu0 }
  0xe8   : > { %772 = vst.msk [vmem:[%s2077_s17 + $0x1c] sm:$0xf] %vm764_vm2, %v1548_v52  ;;  %v1547_v54 = vpack.c.bf16 %v2131_v53, %v2131_v53  ;;  %1747 = vmatprep.mubr.msk.f32.mxu1 %vm801_vm1, %v2131_v53 }
  0xe9   : > { %v2139_v55 = vpop.f32.mrf.mxu0  ;;  %1748 = vmatmul.mubr.msk.f32.gmra.mxu1 %vm801_vm1, %v2123_v51 }
  0xea   : > { %771 = vst.msk [vmem:[%s2077_s17 + $0x18] sm:$0xf] %vm764_vm2, %v1547_v54  ;;  %v1550_v56 = vpack.c.bf16 %v2139_v55, %v2139_v55 }
  0xeb   : > { %v2147_v57 = vpop.f32.mrf.mxu0 }
  0xec   : > { %774 = vst.msk [vmem:[%s2077_s17 + $0x24] sm:$0xf] %vm764_vm2, %v1550_v56  ;;  %v1549_v58 = vpack.c.bf16 %v2147_v57, %v2147_v57  ;;  %1750 = vmatprep.mubr.msk.f32.mxu1 %vm801_vm1, %v2147_v57 }
  0xed   : > { %v2155_v59 = vpop.f32.mrf.mxu0  ;;  %1751 = vmatmul.mubr.msk.f32.gmra.mxu1 %vm801_vm1, %v2139_v55 }
  0xee   : > { %773 = vst.msk [vmem:[%s2077_s17 + $0x20] sm:$0xf] %vm764_vm2, %v1549_v58  ;;  %v1552_v60 = vpack.c.bf16 %v2155_v59, %v2155_v59 }
  0xef   : > { %v2163_v61 = vpop.f32.mrf.mxu0 }
  0xf0   : > { %776 = vst.msk [vmem:[%s2077_s17 + $0x2c] sm:$0xf] %vm764_vm2, %v1552_v60  ;;  %v1551_v62 = vpack.c.bf16 %v2163_v61, %v2163_v61  ;;  %1753 = vmatprep.mubr.msk.f32.mxu1 %vm801_vm1, %v2163_v61 }
  0xf1   : > { %v2171_v63 = vpop.f32.mrf.mxu0  ;;  %1754 = vmatmul.mubr.msk.f32.gmra.mxu1 %vm801_vm1, %v2155_v59 }
  0xf2   : > { %775 = vst.msk [vmem:[%s2077_s17 + $0x28] sm:$0xf] %vm764_vm2, %v1551_v62  ;;  %v1554_v0 = vpack.c.bf16 %v2171_v63, %v2171_v63 }
  0xf3   : > { %v2179_v1 = vpop.f32.mrf.mxu0 }
  0xf4   : > { %778 = vst.msk [vmem:[%s2077_s17 + $0x34] sm:$0xf] %vm764_vm2, %v1554_v0  ;;  %v1553_v2 = vpack.c.bf16 %v2179_v1, %v2179_v1  ;;  %1756 = vmatprep.mubr.msk.f32.mxu1 %vm801_vm1, %v2179_v1 }
  0xf5   : > { %v2187_v3 = vpop.f32.mrf.mxu0  ;;  %1757 = vmatmul.mubr.msk.f32.gmra.mxu1 %vm801_vm1, %v2171_v63 }
  0xf6   : > { %777 = vst.msk [vmem:[%s2077_s17 + $0x30] sm:$0xf] %vm764_vm2, %v1553_v2  ;;  %v1556_v4 = vpack.c.bf16 %v2187_v3, %v2187_v3 }
  0xf7   : > { %v2195_v5 = vpop.f32.mrf.mxu0 }
  0xf8   : > { %780 = vst.msk [vmem:[%s2077_s17 + $0x3c] sm:$0xf] %vm764_vm2, %v1556_v4  ;;  %v1555_v6 = vpack.c.bf16 %v2195_v5, %v2195_v5  ;;  %1759 = vmatprep.mubr.msk.f32.mxu1 %vm801_vm1, %v2195_v5 }
  0xf9   : > { %v2203_v7 = vpop.f32.mrf.mxu0  ;;  %1760 = vmatmul.mubr.msk.f32.gmra.mxu1 %vm801_vm1, %v2187_v3 }
  0xfa   : > { %779 = vst.msk [vmem:[%s2077_s17 + $0x38] sm:$0xf] %vm764_vm2, %v1555_v6  ;;  %v1558_v8 = vpack.c.bf16 %v2203_v7, %v2203_v7 }
  0xfb   : > { %v2211_v9 = vpop.f32.mrf.mxu0 }
  0xfc   : > { %782 = vst.msk [vmem:[%s2077_s17 + $0x44] sm:$0xf] %vm764_vm2, %v1558_v8  ;;  %v1557_v10 = vpack.c.bf16 %v2211_v9, %v2211_v9  ;;  %1762 = vmatprep.mubr.msk.f32.mxu1 %vm801_vm1, %v2211_v9 }
  0xfd   : > { %v2219_v11 = vpop.f32.mrf.mxu0  ;;  %1763 = vmatmul.mubr.msk.f32.gmra.mxu1 %vm801_vm1, %v2203_v7 }
  0xfe   : > { %781 = vst.msk [vmem:[%s2077_s17 + $0x40] sm:$0xf] %vm764_vm2, %v1557_v10  ;;  %v1560_v12 = vpack.c.bf16 %v2219_v11, %v2219_v11 }
  0xff   : > { %v2227_v13 = vpop.f32.mrf.mxu0 }
 0x100   : > { %784 = vst.msk [vmem:[%s2077_s17 + $0x4c] sm:$0xf] %vm764_vm2, %v1560_v12  ;;  %v1559_v14 = vpack.c.bf16 %v2227_v13, %v2227_v13  ;;  %1765 = vmatprep.mubr.msk.f32.mxu1 %vm801_vm1, %v2227_v13 }
 0x101   : > { %v2235_v15 = vpop.f32.mrf.mxu0  ;;  %1766 = vmatmul.mubr.msk.f32.gmra.mxu1 %vm801_vm1, %v2219_v11 }
 0x102   : > { %783 = vst.msk [vmem:[%s2077_s17 + $0x48] sm:$0xf] %vm764_vm2, %v1559_v14  ;;  %v1562_v16 = vpack.c.bf16 %v2235_v15, %v2235_v15 }
 0x103   : > { %v2243_v17 = vpop.f32.mrf.mxu0 }
 0x104   : > { %786 = vst.msk [vmem:[%s2077_s17 + $0x54] sm:$0xf] %vm764_vm2, %v1562_v16  ;;  %v1561_v18 = vpack.c.bf16 %v2243_v17, %v2243_v17  ;;  %1768 = vmatprep.mubr.msk.f32.mxu1 %vm801_vm1, %v2243_v17 }
 0x105   : > { %v1717_v19 = vpop.f32.mrf.mxu0  ;;  %1769 = vmatmul.mubr.msk.f32.gmra.mxu1 %vm801_vm1, %v2235_v15 }
 0x106   : > { %785 = vst.msk [vmem:[%s2077_s17 + $0x50] sm:$0xf] %vm764_vm2, %v1561_v18  ;;  %v1564_v20 = vpack.c.bf16 %v1717_v19, %v1717_v19 }
 0x107   : > { %v587_v21 = vpop.f32.mrf.mxu0 }
 0x108   : > { %788 = vst.msk [vmem:[%s2077_s17 + $0x5c] sm:$0xf] %vm764_vm2, %v1564_v20  ;;  %v1563_v22 = vpack.c.bf16 %v587_v21, %v587_v21  ;;  %1771 = vmatprep.mubr.msk.f32.mxu1 %vm801_vm1, %v587_v21 }
 0x109   : > { %v1720_v23 = vpop.f32.mrf.mxu0  ;;  %1772 = vmatmul.mubr.msk.f32.gmra.mxu1 %vm801_vm1, %v1717_v19 }
 0x10a   : > { %787 = vst.msk [vmem:[%s2077_s17 + $0x58] sm:$0xf] %vm764_vm2, %v1563_v22  ;;  %v1566_v24 = vpack.c.bf16 %v1720_v23, %v1720_v23 }
 0x10b   : > { %v597_v25 = vpop.f32.mrf.mxu0 }
 0x10c   : > { %790 = vst.msk [vmem:[%s2077_s17 + $0x64] sm:$0xf] %vm764_vm2, %v1566_v24  ;;  %v1565_v26 = vpack.c.bf16 %v597_v25, %v597_v25  ;;  %1774 = vmatprep.mubr.msk.f32.mxu1 %vm801_vm1, %v597_v25 }
 0x10d   : > { %v1723_v27 = vpop.f32.mrf.mxu0  ;;  %1775 = vmatmul.mubr.msk.f32.gmra.mxu1 %vm801_vm1, %v1720_v23 }
 0x10e   : > { %789 = vst.msk [vmem:[%s2077_s17 + $0x60] sm:$0xf] %vm764_vm2, %v1565_v26  ;;  %v1568_v28 = vpack.c.bf16 %v1723_v27, %v1723_v27 }
 0x10f   : > { %v607_v29 = vpop.f32.mrf.mxu0 }
 0x110   : > { %792 = vst.msk [vmem:[%s2077_s17 + $0x6c] sm:$0xf] %vm764_vm2, %v1568_v28  ;;  %v1567_v30 = vpack.c.bf16 %v607_v29, %v607_v29  ;;  %1777 = vmatprep.mubr.msk.f32.mxu1 %vm801_vm1, %v607_v29 }
 0x111   : > { %v1726_v31 = vpop.f32.mrf.mxu0  ;;  %1778 = vmatmul.mubr.msk.f32.gmra.mxu1 %vm801_vm1, %v1723_v27 }
 0x112   : > { %791 = vst.msk [vmem:[%s2077_s17 + $0x68] sm:$0xf] %vm764_vm2, %v1567_v30  ;;  %v1570_v32 = vpack.c.bf16 %v1726_v31, %v1726_v31 }
 0x113   : > { %v617_v33 = vpop.f32.mrf.mxu0 }
 0x114   : > { %794 = vst.msk [vmem:[%s2077_s17 + $0x74] sm:$0xf] %vm764_vm2, %v1570_v32  ;;  %v1569_v34 = vpack.c.bf16 %v617_v33, %v617_v33  ;;  %1780 = vmatprep.mubr.msk.f32.mxu1 %vm801_vm1, %v617_v33 }
 0x115   : > { %v1729_v35 = vpop.f32.mrf.mxu0  ;;  %1781 = vmatmul.mubr.msk.f32.gmra.mxu1 %vm801_vm1, %v1726_v31 }
 0x116   : > { %793 = vst.msk [vmem:[%s2077_s17 + $0x70] sm:$0xf] %vm764_vm2, %v1569_v34  ;;  %v1572_v36 = vpack.c.bf16 %v1729_v35, %v1729_v35  ;;  %1644 = vmatprep.subr.msk.mxu0 %vm801_vm1, %v1729_v35 }
 0x117   : > { %v627_v37 = vpop.f32.mrf.mxu0  ;;  %1645 = vmatpush3.xpose.msk.msra.mxu0 %vm801_vm1, %v2187_v3 }
 0x118   : > { %796 = vst.msk [vmem:[%s2077_s17 + $0x7c] sm:$0xf] %vm764_vm2, %v1572_v36  ;;  %v1571_v40 = vpack.c.bf16 %v627_v37, %v627_v37  ;;  %1783 = vmatprep.mubr.msk.f32.mxu1 %vm801_vm1, %v627_v37  ;;  %1646 = vmatprep.subr.msk.mxu0 %vm801_vm1, %v627_v37 }
 0x119   : > { %1784 = vmatmul.mubr.msk.f32.gmra.mxu1 %vm801_vm1, %v1729_v35 }
 0x11a   : > { %795 = vst.msk [vmem:[%s2077_s17 + $0x78] sm:$0xf] %vm764_vm2, %v1571_v40  ;;  %s1832_s17 = scalar_lea.vmem %s1831_s16, 64 }
 0x11b   : > { %1647 = vmatpush3.xpose.msk.msra.mxu0 %vm801_vm1, %v2195_v5  ;;  %p1834_p1 = scmp.lt.s32.totalorder %s1832_s17, %s1826_s14 }
 0x11c   : > { %1648 = vmatprep.subr.msk.mxu0 %vm801_vm1, %v1726_v31 }
 0x11d   : > { %p1835_p2 = por %p1834_p1, %p1833_p0 }
 0x11f   : > { %1649 = vmatpush3.xpose.msk.msra.mxu0 %vm801_vm1, %v2171_v63  ;;  %p1836_p3 = pnand %p1835_p2, %p1829_p13 }
 0x120   : > { %1650 = vmatprep.subr.msk.mxu0 %vm801_vm1, %v617_v33 }
 0x123   : > { %1651 = vmatpush3.xpose.msk.msra.mxu0 %vm801_vm1, %v2179_v1 }
 0x124   : > { %1652 = vmatprep.subr.msk.mxu0 %vm801_vm1, %v1723_v27 }
 0x127   : > { %1653 = vmatpush3.xpose.msk.msra.mxu0 %vm801_vm1, %v2155_v59 }
 0x128   : > { %1654 = vmatprep.subr.msk.mxu0 %vm801_vm1, %v607_v29 }
 0x12b   : > { %1655 = vmatpush3.xpose.msk.msra.mxu0 %vm801_vm1, %v2163_v61 }
 0x12c   : > { %1656 = vmatprep.subr.msk.mxu0 %vm801_vm1, %v1720_v23 }
 0x12f   : > { %1657 = vmatpush3.xpose.msk.msra.mxu0 %vm801_vm1, %v2139_v55 }
 0x130   : > { %1658 = vmatprep.subr.msk.mxu0 %vm801_vm1, %v597_v25 }
 0x133   : > { %1659 = vmatpush3.xpose.msk.msra.mxu0 %vm801_vm1, %v2147_v57 }
 0x134   : > { %1660 = vmatprep.subr.msk.mxu0 %vm801_vm1, %v1717_v19 }
 0x137   : > { %1661 = vmatpush3.xpose.msk.msra.mxu0 %vm801_vm1, %v2123_v51 }
 0x138   : > { %1662 = vmatprep.subr.msk.mxu0 %vm801_vm1, %v587_v21 }
 0x13b   : > { %1663 = vmatpush3.xpose.msk.msra.mxu0 %vm801_vm1, %v2131_v53 }
 0x13c   : > { %1664 = vmatprep.subr.msk.mxu0 %vm801_vm1, %v2235_v15 }
 0x13f   : > { %1665 = vmatpush3.xpose.msk.msra.mxu0 %vm801_vm1, %v2107_v47 }
 0x140   : > { %1666 = vmatprep.subr.msk.mxu0 %vm801_vm1, %v2243_v17 }
 0x143   : > { %1667 = vmatpush3.xpose.msk.msra.mxu0 %vm801_vm1, %v2115_v49 }
 0x144   : > { %1668 = vmatprep.subr.msk.mxu0 %vm801_vm1, %v2219_v11 }
 0x147   : > { %1669 = vmatpush3.xpose.msk.msra.mxu0 %vm801_vm1, %v2091_v43 }
 0x148   : > { %1670 = vmatprep.subr.msk.mxu0 %vm801_vm1, %v2227_v13 }
 0x14b   : > { %1671 = vmatpush3.xpose.msk.msra.mxu0 %vm801_vm1, %v2099_v45 }
 0x14c   : > { %1672 = vmatprep.subr.msk.mxu0 %vm801_vm1, %v2203_v7  ;;  %v1888_v7 = vmov 1966171168  }
 0x14d   : > { %v1235_v8 = vunpack.c.l.s4 %v1888_v7 }
 0x14f   : > { %1673 = vmatpush3.xpose.msk.msra.mxu0 %vm801_vm1, %v2079_v39  ;;  %v1236_v10 = vunpack.c.0.s8 %v1235_v8 }
 0x150   : > { %1674 = vmatprep.subr.msk.mxu0 %vm801_vm1, %v2211_v9  ;;  %v1237_v9 = vlaneseq }
 0x152   : > { %v1238_v11 = vshrl.u32 %v1237_v9, 7  ;;  %vm1251_vm4 = vcmp.lt.s32.totalorder %v1237_v9, 256 }
 0x153   : > { %1675 = vmatpush3.xpose.msk.msra.mxu0 %vm801_vm1, %v2083_v41 }
 0x154   : > { %v1239_v13 = vsub.s32 %v1236_v10, %v1238_v11 }
 0x156   : > { %1677 = vmatmul.mubr.msk.f32.vlgmr.msra.gmra.mxu0 %vm801_vm1, %v2069_v38 }
 0x19d   : > { %v1740_v39 = vpop.f32.mrf.mxu1 }
 0x19e   : > { %1125 = vst.msk [vmem:[%s2346_s26 + $0x8] sm:$0xff] %vm1123_vm3, %v1740_v39 }
 0x19f   : > { %v964_v38 = vpop.f32.mrf.mxu1 }
 0x1a0   : > { %1124 = vst.msk [vmem:[%s2346_s26] sm:$0xff] %vm1123_vm3, %v964_v38 }
 0x1a1   : > { %v1743_v41 = vpop.f32.mrf.mxu1 }
 0x1a2   : > { %1127 = vst.msk [vmem:[%s2346_s26 + $0x18] sm:$0xff] %vm1123_vm3, %v1743_v41 }
 0x1a3   : > { %v974_v42 = vpop.f32.mrf.mxu1 }
 0x1a4   : > { %1126 = vst.msk [vmem:[%s2346_s26 + $0x10] sm:$0xff] %vm1123_vm3, %v974_v42 }
 0x1a5   : > { %v1746_v43 = vpop.f32.mrf.mxu1 }
 0x1a6   : > { %1129 = vst.msk [vmem:[%s2346_s26 + $0x28] sm:$0xff] %vm1123_vm3, %v1746_v43 }
 0x1a7   : > { %v984_v44 = vpop.f32.mrf.mxu1 }
 0x1a8   : > { %1128 = vst.msk [vmem:[%s2346_s26 + $0x20] sm:$0xff] %vm1123_vm3, %v984_v44 }
 0x1a9   : > { %v1749_v45 = vpop.f32.mrf.mxu1 }
 0x1aa   : > { %1131 = vst.msk [vmem:[%s2346_s26 + $0x38] sm:$0xff] %vm1123_vm3, %v1749_v45 }
 0x1ab   : > { %v994_v46 = vpop.f32.mrf.mxu1 }
 0x1ac   : > { %1130 = vst.msk [vmem:[%s2346_s26 + $0x30] sm:$0xff] %vm1123_vm3, %v994_v46 }
 0x1ad   : > { %v1752_v47 = vpop.f32.mrf.mxu1 }
 0x1ae   : > { %1133 = vst.msk [vmem:[%s2346_s26 + $0x48] sm:$0xff] %vm1123_vm3, %v1752_v47 }
 0x1af   : > { %v1004_v48 = vpop.f32.mrf.mxu1 }
 0x1b0   : > { %1132 = vst.msk [vmem:[%s2346_s26 + $0x40] sm:$0xff] %vm1123_vm3, %v1004_v48 }
 0x1b1   : > { %v1755_v49 = vpop.f32.mrf.mxu1 }
 0x1b2   : > { %1135 = vst.msk [vmem:[%s2346_s26 + $0x58] sm:$0xff] %vm1123_vm3, %v1755_v49 }
 0x1b3   : > { %v1014_v50 = vpop.f32.mrf.mxu1 }
 0x1b4   : > { %1134 = vst.msk [vmem:[%s2346_s26 + $0x50] sm:$0xff] %vm1123_vm3, %v1014_v50 }
 0x1b5   : > { %v1758_v51 = vpop.f32.mrf.mxu1 }
 0x1b6   : > { %1137 = vst.msk [vmem:[%s2346_s26 + $0x68] sm:$0xff] %vm1123_vm3, %v1758_v51 }
 0x1b7   : > { %v1024_v52 = vpop.f32.mrf.mxu1 }
 0x1b8   : > { %1136 = vst.msk [vmem:[%s2346_s26 + $0x60] sm:$0xff] %vm1123_vm3, %v1024_v52 }
 0x1b9   : > { %v1761_v53 = vpop.f32.mrf.mxu1 }
 0x1ba   : > { %1139 = vst.msk [vmem:[%s2346_s26 + $0x78] sm:$0xff] %vm1123_vm3, %v1761_v53 }
 0x1bb   : > { %v1034_v54 = vpop.f32.mrf.mxu1 }
 0x1bc   : > { %1138 = vst.msk [vmem:[%s2346_s26 + $0x70] sm:$0xff] %vm1123_vm3, %v1034_v54 }
 0x1bd   : > { %v1764_v55 = vpop.f32.mrf.mxu1 }
 0x1be   : > { %1141 = vst.msk [vmem:[%s2346_s26 + $0x88] sm:$0xff] %vm1123_vm3, %v1764_v55 }
 0x1bf   : > { %v1044_v56 = vpop.f32.mrf.mxu1 }
 0x1c0   : > { %1140 = vst.msk [vmem:[%s2346_s26 + $0x80] sm:$0xff] %vm1123_vm3, %v1044_v56 }
 0x1c1   : > { %v1767_v57 = vpop.f32.mrf.mxu1 }
 0x1c2   : > { %1143 = vst.msk [vmem:[%s2346_s26 + $0x98] sm:$0xff] %vm1123_vm3, %v1767_v57 }
 0x1c3   : > { %v1054_v58 = vpop.f32.mrf.mxu1 }
 0x1c4   : > { %1142 = vst.msk [vmem:[%s2346_s26 + $0x90] sm:$0xff] %vm1123_vm3, %v1054_v58 }
 0x1c5   : > { %v1770_v59 = vpop.f32.mrf.mxu1 }
 0x1c6   : > { %1145 = vst.msk [vmem:[%s2346_s26 + $0xa8] sm:$0xff] %vm1123_vm3, %v1770_v59 }
 0x1c7   : > { %v1064_v60 = vpop.f32.mrf.mxu1 }
 0x1c8   : > { %1144 = vst.msk [vmem:[%s2346_s26 + $0xa0] sm:$0xff] %vm1123_vm3, %v1064_v60 }
 0x1c9   : > { %v1773_v61 = vpop.f32.mrf.mxu1 }
 0x1ca   : > { %1147 = vst.msk [vmem:[%s2346_s26 + $0xb8] sm:$0xff] %vm1123_vm3, %v1773_v61 }
 0x1cb   : > { %v1074_v62 = vpop.f32.mrf.mxu1 }
 0x1cc   : > { %1146 = vst.msk [vmem:[%s2346_s26 + $0xb0] sm:$0xff] %vm1123_vm3, %v1074_v62 }
 0x1cd   : > { %v1776_v63 = vpop.f32.mrf.mxu1 }
 0x1ce   : > { %1149 = vst.msk [vmem:[%s2346_s26 + $0xc8] sm:$0xff] %vm1123_vm3, %v1776_v63 }
 0x1cf   : > { %v1084_v0 = vpop.f32.mrf.mxu1 }
 0x1d0   : > { %1148 = vst.msk [vmem:[%s2346_s26 + $0xc0] sm:$0xff] %vm1123_vm3, %v1084_v0 }
 0x1d1   : > { %v1779_v1 = vpop.f32.mrf.mxu1 }
 0x1d2   : > { %1151 = vst.msk [vmem:[%s2346_s26 + $0xd8] sm:$0xff] %vm1123_vm3, %v1779_v1 }
 0x1d3   : > { %v1094_v2 = vpop.f32.mrf.mxu1 }
 0x1d4   : > { %1150 = vst.msk [vmem:[%s2346_s26 + $0xd0] sm:$0xff] %vm1123_vm3, %v1094_v2 }
 0x1d5   : > { %v1782_v3 = vpop.f32.mrf.mxu1 }
 0x1d6   : > { %1153 = vst.msk [vmem:[%s2346_s26 + $0xe8] sm:$0xff] %vm1123_vm3, %v1782_v3 }
 0x1d7   : > { %v1104_v4 = vpop.f32.mrf.mxu1 }
 0x1d8   : > { %1152 = vst.msk [vmem:[%s2346_s26 + $0xe0] sm:$0xff] %vm1123_vm3, %v1104_v4 }
 0x1d9   : > { %v1785_v5 = vpop.f32.mrf.mxu1 }
 0x1da   : > { %1155 = vst.msk [vmem:[%s2346_s26 + $0xf8] sm:$0xff] %vm1123_vm3, %v1785_v5 }
 0x1db   : > { %v1114_v6 = vpop.f32.mrf.mxu1 }
 0x1dc   : > { %1154 = vst.msk [vmem:[%s2346_s26 + $0xf0] sm:$0xff] %vm1123_vm3, %v1114_v6 }
 0x216   : > { %v1226_v12 = vpop.f32.mrf.mxu0 }
 0x218   : > { %v1228_v14 = vpop.f32.mrf.mxu0 }
 0x219   : > { %v1233_v15 = vcombine.low %v1226_v12, %v1228_v14 }
 0x21b   : > { %v1240_v16 = vrot.slane %v1233_v15, %v1239_v13 }
 0x21d   : > { %v1247_v17 = vrot.slane %v1240_v16, %v1239_v13 }
 0x21f   : > { %1253 = vst.msk [vmem:[%s260_s28] sm:$0x3] %vm1251_vm4, %v1247_v17 }
 0x220   : > { %1839 = shalt.err (!%p1836_p3)
}
 0x221   : > { %s1840_s20 = scalar_lea.hbm %s1285_s11, 32  ;;  %s1844_s26 = scalar_lea.hbm %s2452_s6, 128 }
 0x222   : > { %p1841_p4 = scmp.ne.s32.totalorder %s1285_s11, %s1840_s20  ;;  %p1845_p9 = scmp.lt.s32.totalorder %s1285_s11, %s2452_s6 }
 0x223   : > { %p1846_p10 = scmp.lt.s32.totalorder %s1844_s26, %s1840_s20 }
 0x224   : > { %p1842_p7 = pnand %p1841_p4, %p1960_p5 }
 0x225   : > { %p1847_p11 = por %p1846_p10, %p1845_p9 }
 0x226   : > { %p1843_p8 = pneg %p1842_p7 }
 0x228   : > { %p1848_p12 = pnand %p1847_p11, %p1843_p8 }
 0x22a   : > { %1851 = shalt.err (!%p1848_p12)
}
 0x22b   : > { %1786 = dma.vmem_to_hbm [thread:$0]  (%p1960_p5), %s1288_s29, 32, %s1285_s11, %s1265_s12  }
 0x22c PF: > { %p1792_p13 = scmp.ge.s32.totalorder %s1886_s24, 2  ;;  %s1315_s28 = sand.u32 1, %s1874_s21  }
 0x22d   : > { %s1316_s9 = scalar_lea.sflag [#allocation3], %s1315_s28 }
 0x22e   : > { %p1789_p0 = pnand %p1792_p13, %p1964_p6 }
 0x230   : > { %p1790_p1 = pneg %p1789_p0 }
 0x232   : > { %1869 = dma.done.wait (%p1790_p1), %s1316_s9, 32  }
 0x233   : > { %1871 = vsyncadd (%p1790_p1), %s1316_s9, 4294967264  ;;  %p17_p2 = scmp.ge.s32.totalorder %s1948_s27, 6   ;;  %s2455_s21 = smov %s1878_s22 }
 0x234   : > { %s2456_s22 = smov %s1882_s23  ;;  %s2457_s23 = smov %s1958_s30 }
 0x235   : > { %s2458_s24 = smov %s1948_s27  ;;  %19 = sbr.rel (!%p17_p2) target bundleno = 3 (0x3), region = 95 }
 0x23a   :  { %1321 = vsyncpa [#allocation3], 1 }
 0x23b   :  { %1323 = vsyncpa [#allocation3 + $0x1], 1 }

</bundles_post_ra>
